<compile_context>
chip_gen: v5e
topology: v5e:2x2
jax: 0.10.0
libtpu: 0.0.40
codegen_flags: <defaults>
</compile_context>

<pallas_src>
import jax
import jax.numpy as jnp
from jax.experimental import pallas as pl
from jax.experimental.pallas import tpu as pltpu

DIMS = (1, 2)  # the dims argument of the Transpose module


def _transpose_kernel(x_ref, o_ref):
    # Batch dim is squeezed out by the BlockSpecs:
    #   x_ref tile: (tt, tc);  o_ref tile: (tc, tt)
    # Plain .T lowers to XLU tile transposes, fully hidden under the DMA.
    o_ref[...] = x_ref[...].T


def _select_tiles(T, C, itemsize, budget_bytes):
    """Pick (tt, tc).  Each returned tile dim is either the full extent or a
    multiple of 128 (so both the input (tt, tc) and output (tc, tt) layouts
    satisfy the (8, 128) block rule).  Biases contiguity to the output rows."""
    # Full (T, C) slab per batch: single contiguous DMA in and out.
    if T * C * itemsize <= budget_bytes:
        return T, C
    # Full output rows (tt = T) if a lane-dense tc (>= 128) still fits.
    if C > 128 and T * 128 * itemsize <= budget_bytes:
        tc = (budget_bytes // (T * itemsize)) // 128 * 128
        return T, min(C, max(tc, 128))
    # C is small: only the T axis needs tiling (tc = full C).
    if C <= 128:
        tt = (budget_bytes // (C * itemsize)) // 128 * 128
        return min(T, max(tt, 128)), C
    # Both large: spend the contiguity budget on the write side (tt >> tc).
    tc = 256 if C >= 256 else 128
    tt = (budget_bytes // (tc * itemsize)) // 128 * 128
    return min(T, max(tt, 128)), tc


def transpose_pallas(x, *, tile_budget_bytes=4 << 20):
    """Equivalent to torch.Tensor.transpose(x, 1, 2) for a 3-D (B, T, C) input.

    tile_budget_bytes: per-tile VMEM budget.  Default 4 MiB keeps the
    double-buffered in+out footprint <= 16 MiB (safe on v5e's scoped default);
    raise it (e.g. 8-16 MiB) on v7x/v6e if profiling shows per-step overhead.
    """
    assert x.ndim == 3, "this kernel implements Transpose(dims=(1, 2)) on (B, T, C)"
    B, T, C = x.shape
    itemsize = jnp.dtype(x.dtype).itemsize

    tt, tc = _select_tiles(T, C, itemsize, tile_budget_bytes)

    n_ct = pl.cdiv(C, tc)
    n_tt = pl.cdiv(T, tt)
    # Innermost grid axis advances the output's contiguous (T) dim so
    # consecutive steps write HBM-adjacent output tiles.
    grid = (B, n_ct, n_tt)

    return pl.pallas_call(
        _transpose_kernel,
        out_shape=jax.ShapeDtypeStruct((B, C, T), x.dtype),
        grid_spec=pltpu.PrefetchScalarGridSpec(
            num_scalar_prefetch=0,
            grid=grid,
            # Leading None squeezes the batch dim out of the kernel refs.
            in_specs=[pl.BlockSpec((None, tt, tc), lambda b, ci, ti: (b, ti, ci))],
            out_specs=pl.BlockSpec((None, tc, tt), lambda b, ci, ti: (b, ci, ti)),
        ),
        compiler_params=pltpu.CompilerParams(
            # No reduction axis -> everything parallel (megacore sharding on
            # v7x; B may be 1, so the tile axes are parallel too).
            dimension_semantics=("parallel", "parallel", "parallel"),
            # Explicit headroom for the double-buffered in+out tiles; safe on
            # v5e/v6e (128 MiB physical) and v7x (64 MiB physical).
            vmem_limit_bytes=32 * 1024 * 1024,
        ),
        cost_estimate=pl.CostEstimate(
            flops=0,
            transcendentals=0,
            bytes_accessed=2 * B * T * C * itemsize,
        ),
    )(x)


if __name__ == "__main__":
    key = jax.random.PRNGKey(0)
    k1, k2, k3 = jax.random.split(key, 3)

    # Test 1: small shapes -> full-slab fast path (single contiguous DMA).
    B, T, C = 2, 8, 32
    x_small = jax.random.normal(k1, (B, T, C), dtype=jnp.float32)
    y_small = transpose_pallas(x_small)
    jax.block_until_ready(y_small)
    y_small_ref = jnp.swapaxes(x_small, *DIMS)
    assert y_small.shape == (B, C, T)
    assert jnp.array_equal(y_small, y_small_ref), "Pallas transpose mismatch (small)"

    # Test 2: force the tiled path (tiny budget) -> full-T output rows,
    # lane-dense 128-wide C tiles, ragged last C tile (320 = 2*128 + 64).
    B2, T2, C2 = 2, 256, 320
    x_tiled = jax.random.normal(k2, (B2, T2, C2), dtype=jnp.float32)
    y_tiled = transpose_pallas(x_tiled, tile_budget_bytes=256 * 128 * 4)
    jax.block_until_ready(y_tiled)
    y_tiled_ref = jnp.swapaxes(x_tiled, *DIMS)
    assert y_tiled.shape == (B2, C2, T2)
    assert jnp.array_equal(y_tiled, y_tiled_ref), "Pallas transpose mismatch (tiled)"

    # Test 3: bf16 full-slab path (dtype-aware byte budgeting).
    x_bf16 = jax.random.normal(k3, (2, 16, 64), dtype=jnp.bfloat16)
    y_bf16 = transpose_pallas(x_bf16)
    jax.block_until_ready(y_bf16)
    assert jnp.array_equal(y_bf16, jnp.swapaxes(x_bf16, *DIMS)), \
        "Pallas transpose mismatch (bf16)"

    print("KERNEL_OK")
</pallas_src>

<mosaic_0001>
module attributes {stable_mosaic.version = 11 : i64} {
  func.func @_transpose_kernel(%arg0: i32, %arg1: i32, %arg2: i32, %arg3: memref<1x8x32xf32, #tpu.memory_space<vmem>>, %arg4: memref<1x32x8xf32, #tpu.memory_space<vmem>>) attributes {dimension_semantics = [#tpu.dimension_semantics<parallel>, #tpu.dimension_semantics<parallel>, #tpu.dimension_semantics<parallel>], iteration_bounds = array<i64: 2, 1, 1>, scalar_prefetch = 0 : i64, scratch_operands = 0 : i64, tpu.core_type = #tpu.core_type<tc>, window_params = [{transform_indices = @transform_0, window_bounds = array<i64: 1, 8, 32>}, {transform_indices = @transform_1, window_bounds = array<i64: 1, 32, 8>}]} {
    %c0 = arith.constant 0 : index
    %c0_0 = arith.constant 0 : index
    %c0_1 = arith.constant 0 : index
    %0 = vector.load %arg3[%c0, %c0_0, %c0_1] : memref<1x8x32xf32, #tpu.memory_space<vmem>>, vector<1x8x32xf32>
    %1 = vector.shape_cast %0 : vector<1x8x32xf32> to vector<8x32xf32>
    %2 = tpu.transpose %1, [1, 0] : vector<8x32xf32> -> vector<32x8xf32>
    %c0_2 = arith.constant 0 : index
    %c0_3 = arith.constant 0 : index
    %c0_4 = arith.constant 0 : index
    %3 = vector.load %arg4[%c0_2, %c0_3, %c0_4] : memref<1x32x8xf32, #tpu.memory_space<vmem>>, vector<1x32x8xf32>
    %4 = vector.shape_cast %3 : vector<1x32x8xf32> to vector<32x8xf32>
    %5 = vector.shape_cast %2 : vector<32x8xf32> to vector<1x32x8xf32>
    tpu.vector_store %arg4[%c0_2, %c0_3, %c0_4], %5 {strides = array<i32>} : memref<1x32x8xf32, #tpu.memory_space<vmem>>, vector<1x32x8xf32>,
    return
  }
  func.func @transform_0(%arg0: i32, %arg1: i32, %arg2: i32) -> (i32, i32, i32) {
    %c0_i32 = arith.constant 0 : i32
    return %arg0, %arg2, %arg1 : i32, i32, i32
  }
  func.func @transform_1(%arg0: i32, %arg1: i32, %arg2: i32) -> (i32, i32, i32) {
    %c0_i32 = arith.constant 0 : i32
    return %arg0, %arg1, %arg2 : i32, i32, i32
  }
}

</mosaic_0001>

<bundles_post_ra>
// kernel: tpu_custom_call.1
= control target key start
LH: loop header
LB: loop body
LE: loop exit
PB: predicated region body
PF: predicated region fallthrough
CT: control target
= control target key end

     0   :  { %6 = vsyncpa [#allocation3], 0  ;;  %s574_s0 = inlined_call_operand.hbm [shape: f32[2,8,32], index: 0, kind: input, shape index: {}]   ;;  %s575_s1 = inlined_call_operand.vmem [shape: f32[2,32,8], index: 1, kind: output, shape index: {}]  }
   0x1   :  { %8 = vsyncpa [#allocation3 + $0x1], 0  ;;  %s486_s6 = smov 0   ;;  %s488_s7 = smov 0  }
   0x2   :  { %s490_s8 = smov 0   ;;  %s492_s9 = smov 0  }
   0x3   :  { %s494_s10 = smov 0   ;;  %s496_s11 = smov 0  }
   0x4 LB: > { %s325_s12 = sadd.s32 4294967295, %s474_s11   ;;  %s33_s13 = sadd.s32 1, %s470_s10  ;;  %s474_s11 = sphi %s496_s11, %s14_s11   ;;  %s470_s10 = sphi %s494_s10, %s582_s10   ;;  %s466_s9 = sphi %s492_s9, %s581_s9   ;;  %s462_s8 = sphi %s490_s8, %s580_s8   ;;  %s458_s7 = sphi %s488_s7, %s579_s7   ;;  %s454_s6 = sphi %s486_s6, %s578_s6  }
   0x5   : > { %p35_p0 = scmp.ge.s32.totalorder %s33_s13, 2  ;;  %s44_s14 = sadd.s32 1, %s462_s8 }
   0x6   : > { %p51_p1 = scmp.ne.s32.totalorder %s462_s8, %s458_s7  ;;  %p52_p2 = scmp.eq.s32.totalorder %s474_s11, 0 }
   0x7   : > { %s584_s13 = smov (%p35_p0, %s33_s13), 0  ;;  %p57_p4 = scmp.ne.s32.totalorder %s458_s7, %s454_s6 }
   0x8   : > { %p522_p3 = por %p52_p2, %p51_p1  ;;  %s37_s16 = ssub.s32 %s470_s10, %s584_s13 }
   0x9   : > { %p58_p5 = scmp.eq.s32.totalorder %s325_s12, 0  ;;  %p42_p6 = scmp.eq.s32.totalorder %s37_s16, 0 }
   0xa   : > { %p344_p8 = scmp.lt.s32.totalorder %s474_s11, 2  ;;  %s111_s19 = sand.u32 1, %s462_s8  }
   0xb   : > { %p529_p7 = por %p58_p5, %p57_p4  ;;  %s330_s20 = sshll.u32 %s470_s10, 3 }
   0xc   : > { %s535_s18 = scalar_select %p42_p6, %s462_s8, %s44_s14  }
   0xd   : > { %s329_s21 = sshll.u32 %s111_s19, 3  ;;  %s121_s24 = scalar_lea.hbm %s574_s0, %s330_s20 }
   0xe   : > { %s123_s25 = sshll.u32 %s121_s24, 4  ;;  %s115_s26 = scalar_lea.vmem [#allocation2], %s329_s21  ;;  %s124_s25 = int_to_ptr.hbm [resolvable:$true] %s123_s25 }
   0xf   : > { %s125_s27 = sshll.u32 %s115_s26, 4  ;;  %p341_p9 = pnand %p344_p8, %p522_p3  ;;  %s126_s27 = int_to_ptr.vmem [resolvable:$true] %s125_s27 }
  0x10   : > { %p331_p10 = scmp.ge.s32.totalorder %s474_s11, 1  ;;  %p130_p11 = scmp.lt.s32.totalorder %s474_s11, 3 }
  0x11   : > { %s112_s28 = scalar_lea.sflag [#allocation3], %s111_s19 }
  0x12   : > { %343 = dma.hbm_to_vmem [thread:$0]  (!%p341_p9), %s124_s25, 128, %s126_s27, %s112_s28  }
  0x13   : > { %p131_p12 = pnand %p331_p10, %p130_p11 }
  0x14   : > { %s136_s29 = sand.u32 (!%p131_p12), 1, %s458_s7  }
  0x15   : > { %134 = sbr.rel (%p131_p12) target bundleno = 218 (0xda), region = 24  ;;  %s332_s30 = sshll.u32 (!%p131_p12), %s136_s29, 3 }
  0x16   : > { %s137_s2 = scalar_lea.sflag (!%p131_p12), [#allocation3], %s136_s29  ;;  %s140_s3 = scalar_lea.vmem (!%p131_p12), [#allocation2], %s332_s30 }
  0x1a   : > { %449 = dma.done.wait (%p529_p7), %s137_s2, 128  }
  0x1b   : > { %451 = vsyncadd (%p529_p7), %s137_s2, 4294967168  ;;  %v180_v0 = vld [vmem:[%s140_s3] sm:$0xff]  ;;  %p168_p13 = scmp.lt.s32.totalorder %s466_s9, 1  ;;  %vm213_vm0 = vcmask 64512  }
  0x1c   : > { %181 = vxpose.xlu0.b32.start.end [1/1] (short) (narrow) %v180_v0, 32 }
  0x1d   : > { %s586_s9 = smov (!%p168_p13, %s466_s9), 1 }
  0x1e   : > { %s337_s4 = sshll.u32 %s586_s9, 5 }
  0x1f   : > { %s178_s12 = scalar_lea.vmem %s575_s1, %s337_s4 }
  0xc0   : > { %v197_v1 = vpop.trf.xlu0 }
  0xc1   : > { %214 = vst.msk [vmem:[%s178_s12] sm:$0xff] %vm213_vm0, %v197_v1 }
  0xc8   : > { %v198_v2 = vpop.trf.xlu0 }
  0xc9   : > { %215 = vst.msk [vmem:[%s178_s12 + $0x8] sm:$0xff] %vm213_vm0, %v198_v2 }
  0xd0   : > { %v199_v3 = vpop.trf.xlu0 }
  0xd1   : > { %216 = vst.msk [vmem:[%s178_s12 + $0x10] sm:$0xff] %vm213_vm0, %v199_v3 }
  0xd8   : > { %v200_v4 = vpop.trf.xlu0 }
  0xd9   : > { %217 = vst.msk [vmem:[%s178_s12 + $0x18] sm:$0xff] %vm213_vm0, %v200_v4 }
  0xda PF: > { %s14_s11 = sadd.s32 1, %s474_s11   ;;  %s578_s6 = smov %s458_s7 }
  0xdb   : > { %p11_p0 = scmp.ge.s32.totalorder %s14_s11, 4   ;;  %s579_s7 = smov %s462_s8 }
  0xdc   : > { %s580_s8 = smov %s535_s18  ;;  %s581_s9 = smov %s470_s10 }
  0xdd   : > { %s582_s10 = smov %s584_s13  ;;  %13 = sbr.rel (!%p11_p0) target bundleno = 4 (0x4), region = 64 }
  0xe2   :  { %254 = vsyncpa [#allocation3], 1 }
  0xe3   :  { %256 = vsyncpa [#allocation3 + $0x1], 1 }

</bundles_post_ra>
